<compile_context>
chip_gen: v5e
topology: v5e:2x2
jax: 0.10.0
libtpu: 0.0.40
codegen_flags: <defaults>
</compile_context>

<pallas_src>
import jax
import jax.numpy as jnp
from jax.experimental import pallas as pl
from jax.experimental.pallas import tpu as pltpu


def _round_up(x, m):
    return (x + m - 1) // m * m


def _pick_ftile(total, max_tile):
    """Largest feature tile <= max_tile that divides `total` (total % 128 == 0)."""
    if total <= max_tile:
        return total
    for c in (1024, 512, 256, 128):
        if c <= max_tile and total % c == 0:
            return c
    return 128


def _pick_row_tile(m):
    """Row tile for the flattened GEMM; prefer >= 2 row tiles (v7x megacore)."""
    for c in (512, 256, 128):
        if m % c == 0 and m // c >= 2:
            return c
    return 128


# ---------------------------------------------------------------------------
# Kernel 1: hidden = text @ weight   (flattened tiled GEMM, bf16 in/out)
# ---------------------------------------------------------------------------
def gemm_kernel(x_ref, w_ref, h_ref, acc_ref):
    # x_ref  : (TM, TFi)   bf16 block of flattened text rows
    # w_ref  : (TFi, TFo)  bf16 weight block
    # h_ref  : (TM, TFo)   bf16 output (hidden), written on last Fi step
    # acc_ref: (TM, TFo)   f32 accumulator carried over the Fi ("arbitrary") axis
    ki = pl.program_id(2)

    @pl.when(ki == 0)
    def _init():
        acc_ref[...] = jnp.zeros_like(acc_ref)

    acc_ref[...] += jnp.dot(x_ref[...], w_ref[...],
                            preferred_element_type=jnp.float32)

    @pl.when(ki == pl.num_programs(2) - 1)
    def _finalize():
        h_ref[...] = acc_ref[...].astype(h_ref.dtype)


# ---------------------------------------------------------------------------
# Kernel 2: out = (adj @ hidden) / (rowsum(adj) + 1) + bias
# ---------------------------------------------------------------------------
def agg_kernel(adj_ref, hid_ref, bias_ref, out_ref, denom_ref):
    # adj_ref  : (Bblk, T, T)     bf16 (row-tile i, col-tile k) of adj
    # hid_ref  : (Bblk, T, TFo)   bf16 K-chunk of hidden
    # bias_ref : (1, TFo)         f32
    # out_ref  : (Bblk, T, TFo)   f32 -- used directly as the accumulator
    # denom_ref: (Bblk, T, 1)     f32 row-sum accumulator (VMEM scratch)
    k = pl.program_id(3)

    @pl.when(k == 0)
    def _init():
        out_ref[...] = jnp.zeros_like(out_ref)
        denom_ref[...] = jnp.zeros_like(denom_ref)

    adj = adj_ref[...]                                        # (Bblk, T, T)

    # out += adj_tile @ hidden_k  (batched MXU matmul, bf16 operands, f32 acc)
    out_ref[...] += jnp.einsum('bmk,bkf->bmf', adj, hid_ref[...],
                               preferred_element_type=jnp.float32)

    # denom accumulation: per-tile row sum in f32 (XLU, overlaps MXU work).
    denom_ref[...] += jnp.sum(adj.astype(jnp.float32), axis=2, keepdims=True)

    @pl.when(k == pl.num_programs(3) - 1)
    def _finalize():
        # EUP reciprocal-multiply instead of a per-element VALU divide.
        inv = pl.reciprocal(denom_ref[...] + 1.0, approx=True)
        out_ref[...] = out_ref[...] * inv + bias_ref[...]


def graph_convolution(text, adj, weight, bias=None):
    """text: [B, N, F_in], adj: [B, N, N], weight: [F_in, F_out], bias: [F_out]."""
    B, N, F_in = text.shape
    F_out = weight.shape[1]
    out_dtype = jnp.result_type(text.dtype, weight.dtype)
    bf16 = jnp.bfloat16
    itm = 2  # bf16 bytes

    # ---- lane-dense feature dims (multiples of 128) -------------------------
    Fi = _round_up(F_in, 128)
    Fo = _round_up(F_out, 128)

    # ---- node tile: at least 128 lanes; 512 for large graphs ----------------
    n128 = _round_up(N, 128)
    T = n128 if n128 <= 512 else 512
    Npad = _round_up(N, T)

    # ---- feature tiles -------------------------------------------------------
    TFo2 = _pick_ftile(Fo, 1024)     # aggregation kernel output tile
    TFo1 = _pick_ftile(Fo, 512)      # GEMM output tile (bounds weight block)
    TFi = _pick_ftile(Fi, 512)       # GEMM reduction tile
    fo2_tiles = Fo // TFo2

    # ---- batch folding (small graphs) + v7x >=2 parallel work units ---------
    if T == Npad:
        Bblk = max(1, min(B, 512 // T))
        if (Npad // T) * fo2_tiles == 1:
            Bblk = min(Bblk, max(1, B // 2))
    else:
        Bblk = 1
    Bpad = _round_up(B, Bblk)

    # ---- zero-pad & cast to bf16 (zeros are neutral for matmul / row-sum) ---
    text_p = jnp.pad(text, ((0, Bpad - B), (0, Npad - N), (0, Fi - F_in))).astype(bf16)
    adj_p = jnp.pad(adj, ((0, Bpad - B), (0, Npad - N), (0, Npad - N))).astype(bf16)
    w_p = jnp.pad(weight, ((0, Fi - F_in), (0, Fo - F_out))).astype(bf16)
    if bias is None:
        bias_p = jnp.zeros((1, Fo), jnp.float32)
    else:
        bias_p = jnp.pad(bias, (0, Fo - F_out)).astype(jnp.float32).reshape(1, Fo)

    # =========================================================================
    # Pass 1: hidden = text @ weight  (computed exactly once, stored as bf16)
    # =========================================================================
    M = Bpad * Npad
    TM = _pick_row_tile(M)
    text2d = text_p.reshape(M, Fi)

    n_m, n_f1 = M // TM, Fo // TFo1
    vmem1 = 2 * (TM * TFi + TFi * TFo1 + TM * TFo1) * itm + TM * TFo1 * 4
    vmem1 = int(min(max(2 * vmem1, 32 << 20), 48 << 20))
    cost1 = pl.CostEstimate(
        flops=int(2 * M * Fi * Fo),
        transcendentals=0,
        bytes_accessed=int(M * Fi * itm * n_f1 + Fi * Fo * itm * n_m + M * Fo * itm),
    )

    hidden2d = pl.pallas_call(
        gemm_kernel,
        out_shape=jax.ShapeDtypeStruct((M, Fo), bf16),
        grid_spec=pltpu.PrefetchScalarGridSpec(
            num_scalar_prefetch=0,
            grid=(n_m, n_f1, Fi // TFi),
            in_specs=[
                pl.BlockSpec((TM, TFi), lambda m, f, k: (m, k)),
                pl.BlockSpec((TFi, TFo1), lambda m, f, k: (k, f)),
            ],
            out_specs=pl.BlockSpec((TM, TFo1), lambda m, f, k: (m, f)),
            scratch_shapes=[pltpu.VMEM((TM, TFo1), jnp.float32)],
        ),
        compiler_params=pltpu.CompilerParams(
            dimension_semantics=("parallel", "parallel", "arbitrary"),
            vmem_limit_bytes=vmem1,
        ),
        cost_estimate=cost1,
    )(text2d, w_p)

    hidden = hidden2d.reshape(Bpad, Npad, Fo)

    # =========================================================================
    # Pass 2: out = (adj @ hidden) / (rowsum(adj) + 1) + bias
    # =========================================================================
    n_b, n_i, n_k = Bpad // Bblk, Npad // T, Npad // T
    vmem2 = (2 * (Bblk * T * T * itm + Bblk * T * TFo2 * itm + TFo2 * 4
                  + Bblk * T * TFo2 * 4)
             + Bblk * T * 128 * 4)
    vmem2 = int(min(max(2 * vmem2, 32 << 20), 48 << 20))
    cost2 = pl.CostEstimate(
        flops=int(2 * Bpad * Npad * Npad * Fo),
        transcendentals=int(Bpad * Npad * fo2_tiles),
        bytes_accessed=int(Bpad * Npad * Npad * itm * fo2_tiles
                           + Bpad * Npad * Fo * itm * n_i
                           + Bpad * Npad * Fo * 4 + Fo * 4),
    )

    out_p = pl.pallas_call(
        agg_kernel,
        out_shape=jax.ShapeDtypeStruct((Bpad, Npad, Fo), jnp.float32),
        grid_spec=pltpu.PrefetchScalarGridSpec(
            num_scalar_prefetch=0,
            grid=(n_b, n_i, fo2_tiles, n_k),
            in_specs=[
                pl.BlockSpec((Bblk, T, T), lambda b, i, f, k: (b, i, k)),
                pl.BlockSpec((Bblk, T, TFo2), lambda b, i, f, k: (b, k, f)),
                pl.BlockSpec((1, TFo2), lambda b, i, f, k: (0, f)),
            ],
            out_specs=pl.BlockSpec((Bblk, T, TFo2), lambda b, i, f, k: (b, i, f)),
            scratch_shapes=[pltpu.VMEM((Bblk, T, 1), jnp.float32)],
        ),
        compiler_params=pltpu.CompilerParams(
            dimension_semantics=("parallel", "parallel", "parallel", "arbitrary"),
            vmem_limit_bytes=vmem2,
        ),
        cost_estimate=cost2,
    )(adj_p, hidden, bias_p)

    # Strip padding; cast back to the natural result dtype.
    return out_p[:B, :N, :F_out].astype(out_dtype)


if __name__ == "__main__":
    B, N, F_in, F_out = 2, 8, 32, 32

    key = jax.random.PRNGKey(0)
    k_text, k_adj, k_w, k_b = jax.random.split(key, 4)

    text = jax.random.normal(k_text, (B, N, F_in), dtype=jnp.float32)
    # Non-negative adjacency (typical normalized GCN adjacency)
    adj = jax.random.uniform(k_adj, (B, N, N), dtype=jnp.float32)

    # Deterministic parameter init (shapes from GraphConvolution.__init__)
    stdv = 1.0 / (F_out ** 0.5)
    weight = jax.random.uniform(
        k_w, (F_in, F_out), minval=-stdv, maxval=stdv, dtype=jnp.float32)
    bias = jax.random.uniform(
        k_b, (F_out,), minval=-stdv, maxval=stdv, dtype=jnp.float32)

    out = graph_convolution(text, adj, weight, bias)
    out = jax.block_until_ready(out)

    # Pure-JAX f32 reference check.
    hidden_ref = jnp.matmul(text, weight)
    denom_ref = jnp.sum(adj, axis=2, keepdims=True) + 1.0
    out_ref = jnp.matmul(adj, hidden_ref) / denom_ref + bias
    # Relaxed tolerance: the kernels stream bf16 MXU operands (f32 accumulation)
    # and use the EUP approximate reciprocal for the 1/denom step.
    assert jnp.allclose(out, out_ref, atol=5e-2, rtol=5e-2), "mismatch vs reference"

    print("KERNEL_OK")
</pallas_src>

<mosaic_0001>
module attributes {stable_mosaic.version = 11 : i64} {
  func.func @gemm_kernel(%arg0: i32, %arg1: i32, %arg2: i32, %arg3: memref<128x128xbf16, #tpu.memory_space<vmem>>, %arg4: memref<128x128xbf16, #tpu.memory_space<vmem>>, %arg5: memref<128x128xbf16, #tpu.memory_space<vmem>>, %arg6: memref<128x128xf32, #tpu.memory_space<vmem>>) attributes {dimension_semantics = [#tpu.dimension_semantics<parallel>, #tpu.dimension_semantics<parallel>, #tpu.dimension_semantics<arbitrary>], iteration_bounds = array<i64: 2, 1, 1>, scalar_prefetch = 0 : i64, scratch_operands = 1 : i64, tpu.core_type = #tpu.core_type<tc>, window_params = [{transform_indices = @transform_0, window_bounds = array<i64: 128, 128>}, {transform_indices = @transform_1, window_bounds = array<i64: 128, 128>}, {transform_indices = @transform_2, window_bounds = array<i64: 128, 128>}]} {
    %c0_i32 = arith.constant 0 : i32
    %0 = arith.cmpi eq, %arg2, %c0_i32 : i32
    %1 = arith.extui %0 : i1 to i32
    %c0_i32_0 = arith.constant 0 : i32
    %2 = arith.cmpi ne, %1, %c0_i32_0 : i32
    scf.if %2 {
      %cst_10 = arith.constant 0.000000e+00 : f32
      %12 = vector.broadcast %cst_10 : f32 to vector<128x128xf32>
      %c0_11 = arith.constant 0 : index
      %c0_12 = arith.constant 0 : index
      %13 = vector.load %arg6[%c0_11, %c0_12] : memref<128x128xf32, #tpu.memory_space<vmem>>, vector<128x128xf32>
      tpu.vector_store %arg6[%c0_11, %c0_12], %12 {strides = array<i32>} : memref<128x128xf32, #tpu.memory_space<vmem>>, vector<128x128xf32>,
    } else {
    }
    %c0 = arith.constant 0 : index
    %c0_1 = arith.constant 0 : index
    %3 = vector.load %arg6[%c0, %c0_1] : memref<128x128xf32, #tpu.memory_space<vmem>>, vector<128x128xf32>
    %c0_2 = arith.constant 0 : index
    %c0_3 = arith.constant 0 : index
    %4 = vector.load %arg3[%c0_2, %c0_3] : memref<128x128xbf16, #tpu.memory_space<vmem>>, vector<128x128xbf16>
    %c0_4 = arith.constant 0 : index
    %c0_5 = arith.constant 0 : index
    %5 = vector.load %arg4[%c0_4, %c0_5] : memref<128x128xbf16, #tpu.memory_space<vmem>>, vector<128x128xbf16>
    %cst = arith.constant dense<0.000000e+00> : vector<128x128xf32>
    %6 = tpu.matmul %4, %5, %cst {dimension_numbers = #tpu.dot_dimension_numbers<[1], [0], [0], [1], [0, 0, 1, 1], [], []>} : vector<128x128xbf16>, vector<128x128xbf16>, vector<128x128xf32> -> vector<128x128xf32>
    %7 = arith.addf %3, %6 : vector<128x128xf32>
    %c0_6 = arith.constant 0 : index
    %c0_7 = arith.constant 0 : index
    %8 = vector.load %arg6[%c0_6, %c0_7] : memref<128x128xf32, #tpu.memory_space<vmem>>, vector<128x128xf32>
    tpu.vector_store %arg6[%c0_6, %c0_7], %7 {strides = array<i32>} : memref<128x128xf32, #tpu.memory_space<vmem>>, vector<128x128xf32>,
    %c0_i32_8 = arith.constant 0 : i32
    %9 = arith.cmpi eq, %arg2, %c0_i32_8 : i32
    %10 = arith.extui %9 : i1 to i32
    %c0_i32_9 = arith.constant 0 : i32
    %11 = arith.cmpi ne, %10, %c0_i32_9 : i32
    scf.if %11 {
      %c0_10 = arith.constant 0 : index
      %c0_11 = arith.constant 0 : index
      %12 = vector.load %arg6[%c0_10, %c0_11] : memref<128x128xf32, #tpu.memory_space<vmem>>, vector<128x128xf32>
      %13 = arith.truncf %12 : vector<128x128xf32> to vector<128x128xbf16>
      %c0_12 = arith.constant 0 : index
      %c0_13 = arith.constant 0 : index
      %14 = vector.load %arg5[%c0_12, %c0_13] : memref<128x128xbf16, #tpu.memory_space<vmem>>, vector<128x128xbf16>
      tpu.vector_store %arg5[%c0_12, %c0_13], %13 {strides = array<i32>} : memref<128x128xbf16, #tpu.memory_space<vmem>>, vector<128x128xbf16>,
    } else {
    }
    return
  }
  func.func @transform_0(%arg0: i32, %arg1: i32, %arg2: i32) -> (i32, i32) {
    %c0_i32 = arith.constant 0 : i32
    return %arg0, %arg2 : i32, i32
  }
  func.func @transform_1(%arg0: i32, %arg1: i32, %arg2: i32) -> (i32, i32) {
    %c0_i32 = arith.constant 0 : i32
    return %arg2, %arg1 : i32, i32
  }
  func.func @transform_2(%arg0: i32, %arg1: i32, %arg2: i32) -> (i32, i32) {
    %c0_i32 = arith.constant 0 : i32
    return %arg0, %arg1 : i32, i32
  }
}

</mosaic_0001>

<bundles_post_ra>
// kernel: tpu_custom_call.1
= control target key start
LH: loop header
LB: loop body
LE: loop exit
PB: predicated region body
PF: predicated region fallthrough
CT: control target
= control target key end

     0   :  { %7 = vsyncpa [#allocation4], 0  ;;  %s1218_s0 = inlined_call_operand.hbm [shape: bf16[256,128], index: 0, kind: input, shape index: {}]   ;;  %s1219_s1 = inlined_call_operand.hbm [shape: bf16[128,128], index: 1, kind: input, shape index: {}]   ;;  %s1220_s2 = inlined_call_operand.hbm [shape: bf16[256,128], index: 2, kind: output, shape index: {}]  }
   0x1   :  { %9 = vsyncpa [#allocation4 + $0x1], 0 }
   0x2   :  { %10 = vsyncpa [#allocation7], 0 }
   0x3   :  { %11 = vsyncpa [#allocation5], 0 }
   0x4   :  { %13 = vsyncpa [#allocation5 + $0x1], 0  ;;  %s1049_s9 = smov 0   ;;  %s1051_s10 = smov 0  }
   0x5   :  { %s1053_s11 = smov 0   ;;  %s1055_s12 = smov 0  }
   0x6   :  { %s1057_s13 = smov 0   ;;  %s1059_s14 = smov 0  }
   0x7 LB: > { %s634_s15 = sadd.s32 4294967295, %s1027_s14   ;;  %s635_s16 = sadd.s32 4294967294, %s1027_s14   ;;  %s1027_s14 = sphi %s1059_s14, %s19_s14   ;;  %s1023_s13 = sphi %s1057_s13, %s1232_s13   ;;  %s1019_s12 = sphi %s1055_s12, %s1231_s12   ;;  %s1015_s11 = sphi %s1053_s11, %s1230_s11   ;;  %s1011_s10 = sphi %s1051_s10, %s1229_s10   ;;  %s1007_s9 = sphi %s1049_s9, %s1228_s9  }
   0x8   : > { %p60_p0 = scmp.ne.s32.totalorder %s1011_s10, %s1007_s9  ;;  %p1083_p1 = scmp.eq.s32.totalorder %s634_s15, 0 }
   0x9   : > { %p1087_p2 = scmp.eq.s32.totalorder %s634_s15, 1  ;;  %p120_p3 = scmp.eq.s32.totalorder %s635_s16, 1 }
   0xa   : > { %p1093_p4 = por %p1083_p1, %p60_p0  ;;  %p636_p5 = scmp.ge.s32.totalorder %s1027_s14, 1 }
   0xb   : > { %p1098_p6 = por %p120_p3, %p60_p0  ;;  %p127_p7 = scmp.lt.s32.totalorder %s1027_s14, 3 }
   0xc   : > { %s142_s23 = sshll.u32 %s1219_s1, 4  ;;  %s1029_s25 = smov [#allocation6]   ;;  %s143_s23 = int_to_ptr.hbm [resolvable:$true] %s142_s23 }
   0xd   : > { %p1106_p8 = pnand %p636_p5, %p127_p7  ;;  %s144_s26 = sshll.u32 %s1029_s25, 4  ;;  %s145_s26 = int_to_ptr.vmem [resolvable:$true] %s144_s26 }
   0xe   : > { %p638_p11 = scmp.ge.s32.totalorder %s1027_s14, 2  ;;  %s1030_s27 = smov 64  }
   0xf   : > { %p812_p9 = pneg %p1106_p8  ;;  %s1031_s28 = smov 4  }
  0x10   : > { %s38_s29 = sadd.s32 1, %s1023_s13  ;;  %s47_s30 = sadd.s32 1, %s1015_s11 }
  0x11   : > { %p813_p10 = pnand %p812_p9, %p1083_p1  ;;  %p40_p12 = scmp.ge.s32.totalorder %s38_s29, 2 }
  0x12   : > { %p54_p13 = scmp.ne.s32.totalorder %s1015_s11, %s1011_s10  ;;  %p55_p0 = scmp.eq.s32.totalorder %s1027_s14, 0 }
  0x13   : > { %815 = dma.hbm_to_vmem [thread:$0]  (!%p813_p10), %s143_s23, 1024, %s145_s26, [#allocation7], %s1030_s27, %s1030_s27, %s1031_s28  }
  0x14   : > { %s1234_s29 = smov (%p40_p12, %s38_s29), 0  ;;  %p1125_p3 = por %p55_p0, %p54_p13 }
  0x15   : > { %p1131_p5 = por %p1087_p2, %p54_p13  ;;  %s42_s5 = ssub.s32 %s1023_s13, %s1234_s29 }
  0x16   : > { %p825_p7 = scmp.lt.s32.totalorder %s1027_s14, 2  ;;  %p45_p9 = scmp.eq.s32.totalorder %s42_s5, 0 }
  0x17   : > { %s158_s6 = sand.u32 1, %s1015_s11   ;;  %s715_s15 = sshll.u32 %s1023_s13, 6 }
  0x18   : > { %s639_s7 = sshll.u32 %s158_s6, 6  ;;  %s168_s22 = scalar_lea.hbm %s1218_s0, %s715_s15 }
  0x19   : > { %s1140_s8 = scalar_select %p45_p9, %s1015_s11, %s47_s30  }
  0x1a   : > { %s162_s23 = scalar_lea.vmem [#allocation3], %s639_s7  ;;  %s169_s18 = sshll.u32 %s168_s22, 4  ;;  %s170_s18 = int_to_ptr.hbm [resolvable:$true] %s169_s18 }
  0x1b   : > { %s171_s25 = sshll.u32 %s162_s23, 4  ;;  %p817_p2 = pnand %p825_p7, %p1125_p3  ;;  %s172_s25 = int_to_ptr.vmem [resolvable:$true] %s171_s25 }
  0x1c   : > { %s159_s26 = scalar_lea.sflag [#allocation4], %s158_s6  ;;  %183 = sbr.rel (%p1106_p8) target bundleno = 232 (0xe8), region = 28 }
  0x1d   : > { %819 = dma.hbm_to_vmem [thread:$0]  (!%p817_p2), %s170_s18, 1024, %s172_s25, %s159_s26, %s1030_s27, %s1030_s27, %s1031_s28  }
  0x1e   : > { %s1154_s30 = sand.u32 (!%p1106_p8), 1, %s1011_s10  }
  0x1f   : > { %s643_s5 = sshll.u32 (!%p1106_p8), %s1154_s30, 6  ;;  %s186_s7 = scalar_lea.sflag (!%p1106_p8), [#allocation4], %s1154_s30 }
  0x20   : > { %s1160_s3 = scalar_lea.vmem (!%p1106_p8), [#allocation3], %s643_s5 }
  0x21   : > { %994 = dma.done.wait (%p1093_p4), %s186_s7, 1024  }
  0x22   : > { %996 = vsyncadd (%p1093_p4), %s186_s7, 4294966272 }
  0x23   : > { %998 = dma.done.wait (%p1083_p1), [#allocation7], 1024  }
  0x24   : > { %1000 = vsyncadd (%p1083_p1), [#allocation7], 4294966272  ;;  %v731_v0 = vld [vmem:[#allocation6 + $0x38] sm:$0xff]  ;;  %v730_v1 = vld [vmem:[#allocation6 + $0x30] sm:$0xff]  ;;  %s215_s17 = scalar_lea.vmem [#allocation8], %s643_s5  ;;  %s732_s19 = sshll.u32 %s1019_s12, 6 }
  0x25   : > { %383 = vmatpush.bf16.msra.mxu0 %v731_v0  ;;  %780 = vmatpush.bf16.msra.mxu1 %v731_v0  ;;  %v729_v2 = vld [vmem:[#allocation6 + $0x28] sm:$0xff]  ;;  %v728_v3 = vld [vmem:[#allocation6 + $0x20] sm:$0xff]  ;;  %v727_v4 = vld [vmem:[#allocation6 + $0x18] sm:$0xff]  ;;  %s528_s28 = scalar_lea.hbm %s1220_s2, %s732_s19  ;;  %s529_s6 = sshll.u32 %s215_s17, 4  ;;  %s530_s6 = int_to_ptr.vmem [resolvable:$true] %s529_s6 }
  0x26   : > { %781 = vmatpush.bf16.msra.mxu2 %v731_v0  ;;  %782 = vmatpush.bf16.msra.mxu3 %v731_v0  ;;  %v726_v5 = vld [vmem:[#allocation6 + $0x10] sm:$0xff]  ;;  %v725_v6 = vld [vmem:[#allocation6 + $0x8] sm:$0xff]  ;;  %v724_v7 = vld [vmem:[#allocation6] sm:$0xff]  ;;  %s531_s15 = sshll.u32 %s528_s28, 4  ;;  %s516_s12 = scalar_lea.sflag [#allocation5], %s1154_s30  ;;  %s532_s15 = int_to_ptr.hbm [resolvable:$true] %s531_s15 }
  0x27   : > { %v716_v8 = vld [vmem:[%s1160_s3] sm:$0xff]  ;;  %v718_v9 = vld [vmem:[%s1160_s3 + $0x10] sm:$0xff]  ;;  %v717_v12 = vld [vmem:[%s1160_s3 + $0x8] sm:$0xff]  ;;  %s955_s16 = sshra.s32 %s532_s15, 4  ;;  %s961_s25 = scalar_lea.hbm %s1220_s2, 128  ;;  %s956_s16 = int_to_ptr.hbm [resolvable:$true] %s955_s16 }
  0x28   : > { %v720_v10 = vld [vmem:[%s1160_s3 + $0x20] sm:$0xff]  ;;  %v722_v11 = vld [vmem:[%s1160_s3 + $0x30] sm:$0xff]  ;;  %v719_v13 = vld [vmem:[%s1160_s3 + $0x18] sm:$0xff]  ;;  %s957_s21 = scalar_lea.hbm %s956_s16, 64  ;;  %p962_p10 = scmp.lt.s32.totalorder %s956_s16, %s1220_s2 }
  0x29   : > { %384 = vmatpush.bf16.msra.mxu0 %v730_v1  ;;  %783 = vmatpush.bf16.msra.mxu1 %v730_v1  ;;  %v721_v14 = vld [vmem:[%s1160_s3 + $0x28] sm:$0xff]  ;;  %v723_v15 = vld [vmem:[%s1160_s3 + $0x38] sm:$0xff]  ;;  %p958_p1 = scmp.ne.s32.totalorder %s956_s16, %s957_s21  ;;  %p963_p12 = scmp.lt.s32.totalorder %s961_s25, %s957_s21 }
  0x2a   : > { %784 = vmatpush.bf16.msra.mxu2 %v730_v1  ;;  %785 = vmatpush.bf16.msra.mxu3 %v730_v1 }
  0x2b   : > { %p959_p4 = pnand %p958_p1, %p1131_p5  ;;  %p964_p13 = por %p963_p12, %p962_p10 }
  0x2d   : > { %385 = vmatpush.bf16.msra.mxu0 %v729_v2  ;;  %786 = vmatpush.bf16.msra.mxu1 %v729_v2  ;;  %p960_p8 = pneg %p959_p4 }
  0x2e   : > { %787 = vmatpush.bf16.msra.mxu2 %v729_v2  ;;  %788 = vmatpush.bf16.msra.mxu3 %v729_v2 }
  0x2f   : > { %p965_p0 = pnand %p964_p13, %p960_p8 }
  0x31   : > { %386 = vmatpush.bf16.msra.mxu0 %v728_v3  ;;  %789 = vmatpush.bf16.msra.mxu1 %v728_v3 }
  0x32   : > { %790 = vmatpush.bf16.msra.mxu2 %v728_v3  ;;  %791 = vmatpush.bf16.msra.mxu3 %v728_v3 }
  0x35   : > { %387 = vmatpush.bf16.msra.mxu0 %v727_v4  ;;  %792 = vmatpush.bf16.msra.mxu1 %v727_v4 }
  0x36   : > { %793 = vmatpush.bf16.msra.mxu2 %v727_v4  ;;  %794 = vmatpush.bf16.msra.mxu3 %v727_v4 }
  0x39   : > { %388 = vmatpush.bf16.msra.mxu0 %v726_v5  ;;  %795 = vmatpush.bf16.msra.mxu1 %v726_v5 }
  0x3a   : > { %796 = vmatpush.bf16.msra.mxu2 %v726_v5  ;;  %797 = vmatpush.bf16.msra.mxu3 %v726_v5 }
  0x3d   : > { %389 = vmatpush.bf16.msra.mxu0 %v725_v6  ;;  %798 = vmatpush.bf16.msra.mxu1 %v725_v6 }
  0x3e   : > { %799 = vmatpush.bf16.msra.mxu2 %v725_v6  ;;  %800 = vmatpush.bf16.msra.mxu3 %v725_v6 }
  0x41   : > { %390 = vmatpush.bf16.msra.mxu0 %v724_v7  ;;  %801 = vmatpush.bf16.msra.mxu1 %v724_v7 }
  0x42   : > { %802 = vmatpush.bf16.msra.mxu2 %v724_v7  ;;  %803 = vmatpush.bf16.msra.mxu3 %v724_v7 }
  0x44   : > { %391 = vmatmul.bf16.vlgmr.msra.gmra.mxu0 %v716_v8  ;;  %401 = vmatmul.bf16.vlgmr.msra.gmra.mxu1 %v718_v9 }
  0x45   : > { %411 = vmatmul.bf16.vlgmr.msra.gmra.mxu2 %v720_v10  ;;  %421 = vmatmul.bf16.vlgmr.msra.gmra.mxu3 %v722_v11 }
  0x54   : > { %396 = vmatmul.bf16.gmra.mxu0 %v717_v12  ;;  %406 = vmatmul.bf16.gmra.mxu1 %v719_v13 }
  0x55   : > { %416 = vmatmul.bf16.gmra.mxu2 %v721_v14  ;;  %426 = vmatmul.bf16.gmra.mxu3 %v723_v15 }
  0xc1   : > { %v392_v16 = vpop.f32.mrf.mxu0  ;;  %v402_v17 = vpop.f32.mrf.mxu1 }
  0xc8   : > { %v412_v18 = vpop.f32.mrf.mxu2  ;;  %v422_v19 = vpop.f32.mrf.mxu3 }
  0xc9   : > { %v394_v20 = vpop.f32.mrf.mxu0  ;;  %v404_v21 = vpop.f32.mrf.mxu1 }
  0xca   : > { %v736_v22 = vpack.c.bf16 %v394_v20, %v392_v16  ;;  %v746_v23 = vpack.c.bf16 %v404_v21, %v402_v17 }
  0xcc   : > { %737 = vst [vmem:[%s215_s17] sm:$0xff] %v736_v22  }
  0xcd   : > { %774 = vst [vmem:[%s215_s17 + $0x10] sm:$0xff] %v746_v23  }
  0xd0   : > { %v414_v24 = vpop.f32.mrf.mxu2  ;;  %v424_v25 = vpop.f32.mrf.mxu3 }
  0xd1   : > { %v756_v26 = vpack.c.bf16 %v414_v24, %v412_v18  ;;  %v766_v27 = vpack.c.bf16 %v424_v25, %v422_v19  ;;  %v397_v28 = vpop.f32.mrf.mxu0  ;;  %v407_v29 = vpop.f32.mrf.mxu1 }
  0xd3   : > { %776 = vst [vmem:[%s215_s17 + $0x20] sm:$0xff] %v756_v26  }
  0xd4   : > { %778 = vst [vmem:[%s215_s17 + $0x30] sm:$0xff] %v766_v27  }
  0xd8   : > { %v417_v30 = vpop.f32.mrf.mxu2  ;;  %v427_v31 = vpop.f32.mrf.mxu3 }
  0xd9   : > { %v399_v32 = vpop.f32.mrf.mxu0  ;;  %v409_v33 = vpop.f32.mrf.mxu1 }
  0xda   : > { %v741_v34 = vpack.c.bf16 %v399_v32, %v397_v28  ;;  %v751_v35 = vpack.c.bf16 %v409_v33, %v407_v29 }
  0xdc   : > { %773 = vst [vmem:[%s215_s17 + $0x8] sm:$0xff] %v741_v34  }
  0xdd   : > { %775 = vst [vmem:[%s215_s17 + $0x18] sm:$0xff] %v751_v35  }
  0xe0   : > { %v419_v36 = vpop.f32.mrf.mxu2  ;;  %v429_v37 = vpop.f32.mrf.mxu3 }
  0xe1   : > { %v761_v38 = vpack.c.bf16 %v419_v36, %v417_v30  ;;  %v771_v39 = vpack.c.bf16 %v429_v37, %v427_v31 }
  0xe3   : > { %777 = vst [vmem:[%s215_s17 + $0x28] sm:$0xff] %v761_v38  }
  0xe4   : > { %779 = vst [vmem:[%s215_s17 + $0x38] sm:$0xff] %v771_v39  }
  0xe5   : > { %968 = shalt.err (!%p965_p0)
}
  0xe6   : > { %s1032_s30 = smov 64   ;;  %s1033_s5 = smov 4  }
  0xe7   : > { %810 = dma.vmem_to_hbm [thread:$0]  (%p1131_p5), %s530_s6, 1024, %s532_s15, %s516_s12, %s1032_s30, %s1032_s30, %s1033_s5  }
  0xe8 PF: > { %s546_s7 = sand.u32 1, %s1007_s9   ;;  %p821_p3 = pnand %p638_p11, %p1098_p6 }
  0xe9   : > { %s547_s3 = scalar_lea.sflag [#allocation5], %s546_s7 }
  0xea   : > { %p822_p7 = pneg %p821_p3 }
  0xec   : > { %1002 = dma.done.wait (%p822_p7), %s547_s3, 1024  }
  0xed   : > { %1004 = vsyncadd (%p822_p7), %s547_s3, 4294966272  ;;  %s19_s14 = sadd.s32 1, %s1027_s14   ;;  %s1228_s9 = smov %s1011_s10 }
  0xee   : > { %p16_p9 = scmp.ge.s32.totalorder %s19_s14, 4   ;;  %s1229_s10 = smov %s1015_s11 }
  0xef   : > { %s1230_s11 = smov %s1140_s8  ;;  %s1231_s12 = smov %s1023_s13 }
  0xf0   : > { %s1232_s13 = smov %s1234_s29  ;;  %18 = sbr.rel (!%p16_p9) target bundleno = 7 (0x7), region = 86 }
  0xf5   :  { %553 = vsyncpa [#allocation4], 1 }
  0xf6   :  { %555 = vsyncpa [#allocation4 + $0x1], 1 }
  0xf7   :  { %556 = vsyncpa [#allocation7], 1 }
  0xf8   :  { %557 = vsyncpa [#allocation5], 1 }
  0xf9   :  { %559 = vsyncpa [#allocation5 + $0x1], 1 }

</bundles_post_ra>
